<compile_context>
chip_gen: v6e
topology: v6e:2x2x1
jax: 0.10.0
libtpu: 0.0.40
codegen_flags: <defaults>
</compile_context>

<pallas_src>
import functools

import jax
import jax.numpy as jnp
from jax import lax
from jax.experimental import pallas as pl
from jax.experimental.pallas import tpu as pltpu

_SINGLE_BLOCK_MAX_BYTES = 4 * 1024 * 1024   # per input -> single-block fast path
_TILE_BYTES_SMALL_VMEM = 4 * 1024 * 1024    # per-input tile when VMEM is ~64 MiB (v7x)
_TILE_BYTES_LARGE_VMEM = 8 * 1024 * 1024    # per-input tile when VMEM is ~128 MiB (v5e/v6e)


def _vmem_capacity_bytes():
    """Generation-aware VMEM capacity; conservative (v7x = 64 MiB) on failure."""
    try:
        return int(pltpu.get_tpu_info().vmem_capacity_bytes)
    except Exception:
        return 64 * 1024 * 1024


def _pick_lane_width(n):
    """Widest lane-dense width dividing n (no padding copy).  Falls back to a
    small (<512-element) zero pad only when n is not a multiple of 128."""
    for c in (1024, 512, 256, 128):
        if n % c == 0:
            return c, 0
    c = 512
    return c, (-n) % c


def _rmse_single_block_kernel(yhat_ref, y_ref, out_ref, *, n_elems, eps):
    """Whole (small) problem in one block: one reduce + sqrt, no accumulator."""
    d = yhat_ref[...].astype(jnp.float32) - y_ref[...].astype(jnp.float32)
    total = jnp.sum(d * d)
    mean = total / jnp.float32(n_elems)
    out_ref[...] = jnp.sqrt(jnp.zeros_like(out_ref) + mean + jnp.float32(eps))


def _rmse_tiled_kernel(yhat_ref, y_ref, out_ref, acc_ref, *,
                       rows_valid, block_rows, bpc, ragged):
    """Per grid step: elementwise squared error reduced (VALU-only) into a tiny
    (8, c) VMEM accumulator; one XLU reduce + store of the core's partial sum on
    its last step.  sqrt/normalize happen in the wrapper."""
    j = pl.program_id(0)   # core-split axis ("parallel")
    i = pl.program_id(1)   # reduction steps ("arbitrary")

    @pl.when(i == 0)
    def _():
        acc_ref[...] = jnp.zeros_like(acc_ref)

    d = yhat_ref[...].astype(jnp.float32) - y_ref[...].astype(jnp.float32)
    sq = d * d
    c = sq.shape[-1]

    def _accum(x):
        # (block_rows, c) -> (block_rows//8, 8, c), sum over major axis: pure
        # vreg-wise VALU adds, then a single (8, c) accumulate.
        acc_ref[...] += x.reshape(block_rows // 8, 8, c).sum(axis=0)

    if ragged:
        g = j * bpc + i                      # global block index (unclamped)
        needs_mask = (g + 1) * block_rows > rows_valid

        @pl.when(needs_mask)
        def _():
            row = g * block_rows + lax.broadcasted_iota(jnp.int32, sq.shape, 0)
            _accum(jnp.where(row < rows_valid, sq, 0.0))

        @pl.when(jnp.logical_not(needs_mask))
        def _():
            _accum(sq)
    else:
        _accum(sq)

    @pl.when(i == pl.num_programs(1) - 1)
    def _():
        out_ref[...] = jnp.zeros_like(out_ref) + jnp.sum(acc_ref[...])


def rmse_loss(yhat, y, eps: float = 1e-6):
    """RMSE = sqrt(mean((yhat - y)^2) + eps), matching torch.sqrt(MSELoss()(yhat, y) + eps)."""
    assert yhat.shape == y.shape, "yhat and y must have the same shape"
    n = int(yhat.size)
    itemsize = jnp.dtype(yhat.dtype).itemsize

    c, pad = _pick_lane_width(n)
    rows = (n + pad) // c
    if pad:
        # TODO(synk): rare unaligned case (n % 128 != 0) still materializes one
        # padded copy of each input; common NN tensor sizes never hit this.
        yf = jnp.pad(yhat.reshape(-1), (0, pad)).reshape(rows, c)
        yr = jnp.pad(y.reshape(-1), (0, pad)).reshape(rows, c)
    else:
        yf = yhat.reshape(rows, c)   # free reshape of contiguous data, no HBM copy
        yr = y.reshape(rows, c)

    # ---- single-block fast path (small / mid-size inputs) ----
    if n * itemsize <= _SINGLE_BLOCK_MAX_BYTES:
        kernel = functools.partial(_rmse_single_block_kernel, n_elems=n, eps=eps)
        out = pl.pallas_call(
            kernel,
            out_shape=jax.ShapeDtypeStruct((1, 1), jnp.float32),
            grid_spec=pltpu.PrefetchScalarGridSpec(
                num_scalar_prefetch=0,
                grid=(1,),
                in_specs=[
                    pl.BlockSpec((rows, c), lambda i: (0, 0)),
                    pl.BlockSpec((rows, c), lambda i: (0, 0)),
                ],
                out_specs=pl.BlockSpec((1, 1), lambda i: (0, 0)),
            ),
            compiler_params=pltpu.CompilerParams(
                dimension_semantics=("arbitrary",),
                vmem_limit_bytes=32 * 1024 * 1024,   # safe even w/ v5e 16 MiB default
            ),
        )(yf, yr)
        return out[0, 0]

    # ---- tiled, two-core streaming reduction ----
    sub = max(8, 32 // itemsize)             # sublane packing: 8 f32 / 16 bf16 / 32 i8
    tile_bytes = (_TILE_BYTES_LARGE_VMEM
                  if _vmem_capacity_bytes() >= 100 * 1024 * 1024
                  else _TILE_BYTES_SMALL_VMEM)
    target_rows = max(sub, (tile_bytes // (c * itemsize)) // sub * sub)
    block_rows = max(sub, min((rows // sub) * sub, target_rows))

    total_blocks = int(pl.cdiv(rows, block_rows))
    num_cores = 2 if total_blocks >= 2 else 1
    bpc = int(pl.cdiv(total_blocks, num_cores))          # blocks per core
    ragged = (num_cores * bpc * block_rows) != rows       # partial last block / overshoot
    last_block = total_blocks - 1

    def in_map(j, i):
        # Clamp overshoot blocks (odd block count split over 2 cores) to a valid
        # block; the in-kernel mask zeroes their contribution.
        return (jnp.minimum(j * bpc + i, last_block), 0)

    kernel = functools.partial(
        _rmse_tiled_kernel, rows_valid=rows, block_rows=block_rows,
        bpc=bpc, ragged=ragged)

    # 2 inputs x 2 pipeline buffers x tile + (8, c) accumulator + headroom.
    vmem_limit = int(4 * block_rows * c * itemsize + 8 * c * 4 + 4 * 1024 * 1024)

    partials = pl.pallas_call(
        kernel,
        out_shape=jax.ShapeDtypeStruct((num_cores, 1, 1), jnp.float32),
        grid_spec=pltpu.PrefetchScalarGridSpec(
            num_scalar_prefetch=0,
            grid=(num_cores, bpc),
            in_specs=[
                pl.BlockSpec((block_rows, c), in_map),
                pl.BlockSpec((block_rows, c), in_map),
            ],
            out_specs=pl.BlockSpec((1, 1, 1), lambda j, i: (j, 0, 0)),
            scratch_shapes=[pltpu.VMEM((8, c), jnp.float32)],
        ),
        compiler_params=pltpu.CompilerParams(
            dimension_semantics=("parallel", "arbitrary"),
            vmem_limit_bytes=vmem_limit,
        ),
    )(yf, yr)

    total = jnp.sum(partials)
    return jnp.sqrt(total / jnp.float32(n) + jnp.float32(eps))


if __name__ == "__main__":
    key = jax.random.PRNGKey(0)
    k1, k2, k3, k4, k5, k6 = jax.random.split(key, 6)

    # Primary case: small NCHW image-like tensors (single-block fast path).
    yhat = jax.random.normal(k1, (2, 4, 16, 16), dtype=jnp.float32)
    y = jax.random.normal(k2, (2, 4, 16, 16), dtype=jnp.float32)
    loss = jax.block_until_ready(rmse_loss(yhat, y))
    ref = jnp.sqrt(jnp.mean((yhat - y) ** 2) + 1e-6)
    assert jnp.allclose(loss, ref, rtol=1e-5, atol=1e-6), (loss, ref)

    # Tiled two-core path, evenly-divided blocks (no masking).
    yh2 = jax.random.normal(k3, (4, 4, 512, 512), dtype=jnp.float32)
    y2 = jax.random.normal(k4, (4, 4, 512, 512), dtype=jnp.float32)
    loss2 = jax.block_until_ready(rmse_loss(yh2, y2))
    ref2 = jnp.sqrt(jnp.mean((yh2 - y2) ** 2) + 1e-6)
    assert jnp.allclose(loss2, ref2, rtol=1e-4, atol=1e-6), (loss2, ref2)

    # Tiled path with a ragged trailing block (masked, possibly clamped overshoot).
    yh3 = jax.random.normal(k5, (2, 8, 384, 384), dtype=jnp.float32)
    y3 = jax.random.normal(k6, (2, 8, 384, 384), dtype=jnp.float32)
    loss3 = jax.block_until_ready(rmse_loss(yh3, y3))
    ref3 = jnp.sqrt(jnp.mean((yh3 - y3) ** 2) + 1e-6)
    assert jnp.allclose(loss3, ref3, rtol=1e-4, atol=1e-6), (loss3, ref3)

    print("KERNEL_OK")
</pallas_src>

<mosaic_0001>
module attributes {stable_mosaic.version = 11 : i64} {
  func.func @_rmse_single_block_kernel(%arg0: i32, %arg1: memref<2x1024xf32, #tpu.memory_space<vmem>>, %arg2: memref<2x1024xf32, #tpu.memory_space<vmem>>, %arg3: memref<1x1xf32, #tpu.memory_space<vmem>>) attributes {dimension_semantics = [#tpu.dimension_semantics<arbitrary>], iteration_bounds = array<i64: 1>, scalar_prefetch = 0 : i64, scratch_operands = 0 : i64, tpu.core_type = #tpu.core_type<tc>, window_params = [{pipeline_mode = #tpu.pipeline_mode<synchronous>, transform_indices = @transform_0, window_bounds = array<i64: 2, 1024>}, {pipeline_mode = #tpu.pipeline_mode<synchronous>, transform_indices = @transform_1, window_bounds = array<i64: 2, 1024>}, {pipeline_mode = #tpu.pipeline_mode<synchronous>, transform_indices = @transform_2, window_bounds = array<i64: 1, 1>}]} {
    %c0 = arith.constant 0 : index
    %c0_0 = arith.constant 0 : index
    %0 = vector.load %arg1[%c0, %c0_0] : memref<2x1024xf32, #tpu.memory_space<vmem>>, vector<2x1024xf32>
    %c0_1 = arith.constant 0 : index
    %c0_2 = arith.constant 0 : index
    %1 = vector.load %arg2[%c0_1, %c0_2] : memref<2x1024xf32, #tpu.memory_space<vmem>>, vector<2x1024xf32>
    %2 = arith.subf %0, %1 : vector<2x1024xf32>
    %3 = arith.mulf %2, %2 : vector<2x1024xf32>
    %4 = vector.shape_cast %3 : vector<2x1024xf32> to vector<1x2x1024xf32>
    %cst = arith.constant dense<0.000000e+00> : vector<1xf32>
    %5 = vector.multi_reduction <add>, %4, %cst [1, 2] : vector<1x2x1024xf32> to vector<1xf32>
    %6 = vector.shape_cast %5 : vector<1xf32> to vector<1x1x1xf32>
    %7 = vector.extract %6[0, 0, 0] : f32 from vector<1x1x1xf32>
    %cst_3 = arith.constant 2.048000e+03 : f32
    %8 = arith.divf %7, %cst_3 : f32
    %cst_4 = arith.constant 0.000000e+00 : f32
    %9 = vector.broadcast %cst_4 : f32 to vector<1x1xf32>
    %10 = vector.broadcast %8 : f32 to vector<1x1xf32>
    %11 = arith.addf %9, %10 : vector<1x1xf32>
    %cst_5 = arith.constant 9.99999997E-7 : f32
    %12 = vector.broadcast %cst_5 : f32 to vector<1x1xf32>
    %13 = arith.addf %11, %12 : vector<1x1xf32>
    %14 = math.sqrt %13 : vector<1x1xf32>
    %c0_6 = arith.constant 0 : index
    %c0_7 = arith.constant 0 : index
    %15 = vector.load %arg3[%c0_6, %c0_7] : memref<1x1xf32, #tpu.memory_space<vmem>>, vector<1x1xf32>
    tpu.vector_store %arg3[%c0_6, %c0_7], %14 {strides = array<i32>} : memref<1x1xf32, #tpu.memory_space<vmem>>, vector<1x1xf32>,
    return
  }
  func.func @transform_0(%arg0: i32) -> (i32, i32) {
    %c0_i32 = arith.constant 0 : i32
    %c0_i32_0 = arith.constant 0 : i32
    %c0_i32_1 = arith.constant 0 : i32
    return %c0_i32, %c0_i32_0 : i32, i32
  }
  func.func @transform_1(%arg0: i32) -> (i32, i32) {
    %c0_i32 = arith.constant 0 : i32
    %c0_i32_0 = arith.constant 0 : i32
    %c0_i32_1 = arith.constant 0 : i32
    return %c0_i32, %c0_i32_0 : i32, i32
  }
  func.func @transform_2(%arg0: i32) -> (i32, i32) {
    %c0_i32 = arith.constant 0 : i32
    %c0_i32_0 = arith.constant 0 : i32
    %c0_i32_1 = arith.constant 0 : i32
    return %c0_i32, %c0_i32_0 : i32, i32
  }
}

</mosaic_0001>

<bundles_post_ra>
// kernel: tpu_custom_call.1
= control target key start
LH: loop header
LB: loop body
LE: loop exit
PB: predicated region body
PF: predicated region fallthrough
CT: control target
= control target key end

     0   :  { %7 = vsyncpa [#allocation3], 0  ;;  %s254_s0 = inlined_call_operand.hbm [shape: f32[2,1024], index: 0, kind: input, shape index: {}]   ;;  %s255_s1 = inlined_call_operand.hbm [shape: f32[2,1024], index: 1, kind: input, shape index: {}]   ;;  %s256_s2 = inlined_call_operand.hbm [shape: f32[1,1], index: 2, kind: output, shape index: {}]  }
   0x1   :  { %8 = vsyncpa [#allocation6], 0 }
   0x2   :  { %9 = vsyncpa [#allocation4], 0  ;;  %s218_s9 = smov [#allocation2]   ;;  %s219_s11 = smov [#allocation5]  }
   0x3   :  { %s16_s10 = sshll.u32 %s218_s9, 4  ;;  %s26_s12 = sshll.u32 %s219_s11, 4  ;;  %s17_s10 = int_to_ptr.vmem [resolvable:$true] %s16_s10  ;;  %s27_s12 = int_to_ptr.vmem [resolvable:$true] %s26_s12 }
   0x4   :  { %s160_s13 = scalar_lea.vmem %s17_s10, 256  ;;  %p165_p1 = scmp.lt.s32.totalorder %s17_s10, %s17_s10 }
   0x5   :  { %p161_p0 = scmp.ne.s32.totalorder %s17_s10, %s160_s13  ;;  %p166_p2 = scmp.lt.s32.totalorder %s160_s13, %s160_s13 }
   0x7   :  { %p167_p3 = por %p166_p2, %p165_p1 }
   0x9   :  { %p168_p4 = pnand %p167_p3, %p161_p0 }
   0xb   :  { %171 = shalt.err (!%p168_p4)
}
   0xc   :  { %19 = dma.hbm_to_vmem [thread:$0]  %s254_s0, 256, %s17_s10, [#allocation3]  }
   0xd   :  { %s180_s16 = scalar_lea.vmem %s27_s12, 256  ;;  %p185_p6 = scmp.lt.s32.totalorder %s27_s12, %s27_s12 }
   0xe   :  { %p181_p5 = scmp.ne.s32.totalorder %s27_s12, %s180_s16  ;;  %p186_p7 = scmp.lt.s32.totalorder %s180_s16, %s180_s16 }
  0x10   :  { %p187_p8 = por %p186_p7, %p185_p6 }
  0x12   :  { %p188_p9 = pnand %p187_p8, %p181_p5 }
  0x14   :  { %191 = shalt.err (!%p188_p9)
}
  0x15   :  { %29 = dma.hbm_to_vmem [thread:$0]  %s255_s1, 256, %s27_s12, [#allocation6]  }
  0x16   :  { %212 = dma.done.wait [#allocation3], 256  }
  0x17   :  { %213 = vsyncadd [#allocation3], 4294967040 }
  0x18   :  { %214 = dma.done.wait [#allocation6], 256  }
  0x19   :  { %215 = vsyncadd [#allocation6], 4294967040  ;;  %v50_v0 = vlaneseq  ;;  %v220_v1 = vmov 1983009808   ;;  %v36_v5 = vld [vmem:[#allocation2] sm:$0xff]  ;;  %v37_v6 = vld [vmem:[#allocation2 + $0x8] sm:$0xff] }
  0x1a   :  { %v48_v2 = vunpack.c.l.s4 %v220_v1  ;;  %v38_v7 = vld [vmem:[#allocation5] sm:$0xff]  ;;  %v39_v8 = vld [vmem:[#allocation5 + $0x8] sm:$0xff]  ;;  %vm88_vm0 = vcmask 1041408   ;;  %s221_s19 = smov [#allocation7]   ;;  %vm126_vm2 = vcmask 0  }
  0x1b   :  { %v51_v4 = vshrl.u32 %v50_v0, 7  ;;  %v40_v9 = vsub.f32 %v36_v5, %v38_v7  ;;  %v41_v11 = vsub.f32 %v37_v6, %v39_v8  ;;  %s134_s20 = sshll.u32 %s221_s19, 4  ;;  %s135_s20 = int_to_ptr.vmem [resolvable:$true] %s134_s20 }
  0x1c   :  { %v49_v3 = vunpack.c.0.s8 %v48_v2  ;;  %s192_s21 = scalar_lea.vmem %s135_s20, 16  ;;  %s196_s22 = scalar_lea.vmem %s135_s20, 32 }
  0x1d   :  { %v42_v12 = vmul.f32 %v40_v9, %v40_v9  ;;  %v43_v13 = vmul.f32 %v41_v11, %v41_v11  ;;  %p193_p10 = scmp.ne.s32.totalorder %s135_s20, %s192_s21  ;;  %p197_p11 = scmp.lt.s32.totalorder %s135_s20, %s135_s20 }
  0x1e   :  { %v52_v10 = vsub.s32 %v49_v3, %v51_v4  ;;  %p198_p12 = scmp.lt.s32.totalorder %s196_s22, %s192_s21 }
  0x1f   :  { %v46_v14 = vcombine.high %v42_v12, %v42_v12  ;;  %v63_v16 = vcombine.high %v43_v13, %v43_v13 }
  0x20   :  { %v53_v15 = vrot.slane %v42_v12, %v52_v10  ;;  %v70_v19 = vrot.slane %v43_v13, %v52_v10  ;;  %p199_p13 = por %p198_p12, %p197_p11 }
  0x21   :  { %v60_v17 = vrot.slane %v46_v14, %v52_v10  ;;  %v77_v25 = vrot.slane %v63_v16, %v52_v10 }
  0x22   :  { %v61_v18 = vcombine.high %v53_v15, %v53_v15  ;;  %v89_v20 = vsel %vm88_vm0, %v53_v15, 0.0  ;;  %v78_v26 = vcombine.high %v70_v19, %v70_v19  ;;  %v96_v29 = vsel %vm88_vm0, %v70_v19, 0.0  ;;  %p200_p0 = pnand %p199_p13, %p193_p10 }
  0x23   :  { %v62_v21 = vcombine.high %v60_v17, %v60_v17  ;;  %v92_v23 = vsel %vm88_vm0, %v60_v17, 0.0  ;;  %v79_v31 = vcombine.high %v77_v25, %v77_v25  ;;  %v100_v34 = vsel %vm88_vm0, %v77_v25, 0.0 }
  0x24   :  { %v90_v22 = vsel %vm88_vm0, %v61_v18, 0.0  ;;  %v98_v32 = vsel %vm88_vm0, %v78_v26, 0.0 }
  0x25   :  { %v91_v24 = vadd.f32 %v90_v22, %v89_v20  ;;  %v94_v27 = vsel %vm88_vm0, %v62_v21, 0.0  ;;  %v102_v36 = vsel %vm88_vm0, %v79_v31, 0.0 }
  0x27   :  { %v93_v28 = vadd.f32 %v92_v23, %v91_v24 }
  0x29   :  { %v95_v30 = vadd.f32 %v94_v27, %v93_v28 }
  0x2b   :  { %v97_v33 = vadd.f32 %v96_v29, %v95_v30 }
  0x2d   :  { %v99_v35 = vadd.f32 %v98_v32, %v97_v33 }
  0x2f   :  { %v101_v37 = vadd.f32 %v100_v34, %v99_v35 }
  0x31   :  { %v103_v38 = vadd.f32 %v102_v36, %v101_v37 }
  0x33   :  { %104 = vadd.xlane.f32.xlu0 %v103_v38 }
  0xbc   :  { %v105_v39 = vpop.xlane.xlu0 %104 }
  0xbd   :  { %v106_v40 = vrot.slane %v105_v39, 4 }
  0xbf   :  { %v107_v41 = vadd.f32 %v106_v40, %v105_v39 }
  0xc1   :  { %v108_v42 = vrot.slane %v107_v41, 2 }
  0xc3   :  { %v109_v43 = vadd.f32 %v108_v42, %v107_v41 }
  0xc5   :  { %v110_v44 = vrot.slane %v109_v43, 1 }
  0xc7   :  { %v111_v45 = vadd.f32 %v110_v44, %v109_v43 }
  0xc9   :  { %144 = vpush %v111_v45 }
  0xfa   :  { %s145_s0 = spop %144 }
  0xfb   :  { %s115_s1 = smul.f32 0.00048828125, %s145_s0 }
  0xfd   :  { %v116_v46 = vstv %s115_s1 }
  0xfe   :  { %v118_v47 = vadd.f32 1e-06, %v116_v46 }
 0x100   :  { %150 = vrsqrt.f32 %v118_v47  ;;  %vm121_vm1 = vcmp.eq.f32.partialorder %v118_v47, inf  ;;  %v124_v50 = vand.u32 2147483648, %v118_v47  ;;  %vm123_vm3 = vcmp.eq.f32.partialorder %v118_v47, 0.0 }
 0x10d   :  { %v151_v48 = vpop.eup %150 }
 0x10e   :  { %v120_v49 = vmul.f32 %v151_v48, %v118_v47 }
 0x110   :  { %v122_v51 = vsel %vm121_vm1, %v118_v47, %v120_v49 }
 0x111   :  { %v125_v52 = vsel %vm123_vm3, %v124_v50, %v122_v51 }
 0x112   :  { %127 = vst.msk [vmem:[#allocation7] sm:$0x1] %vm126_vm2, %v125_v52 }
 0x113   :  { %203 = shalt.err (!%p200_p0)
}
 0x114   :  { %137 = dma.vmem_to_hbm [thread:$0]  %s135_s20, 16, %s256_s2, [#allocation4]  }
 0x115   :  { %216 = dma.done.wait [#allocation4], 16  }
 0x116   :  { %217 = vsyncadd [#allocation4], 4294967280 }
 0x117   :  { %141 = vsyncpa [#allocation3], 1 }
 0x118   :  { %142 = vsyncpa [#allocation6], 1 }
 0x119   :  { %143 = vsyncpa [#allocation4], 1 }

</bundles_post_ra>
